<compile_context>
chip_gen: v5e
topology: v5e:2x2
jax: 0.10.0
libtpu: 0.0.40
codegen_flags: <defaults>
</compile_context>

<pallas_src>
import functools
import numpy as np
import jax
import jax.numpy as jnp
from jax.experimental import pallas as pl
from jax.experimental.pallas import tpu as pltpu


# ------------------------- rotation / grid helpers ---------------------------

def make_rotation_matrix(rot_deg):
    rot_rad = np.radians(rot_deg)
    c, s = np.cos(rot_rad), np.sin(rot_rad)
    return np.array([[c, -s, 0.0], [s, c, 0.0]], dtype=np.float32)


def make_rotations(rot_deg_min, rot_deg_max, num_rots):
    return np.stack([make_rotation_matrix(d)
                     for d in np.linspace(rot_deg_min, rot_deg_max, num_rots)])


def affine_grid(theta, k):
    """torch.nn.functional.affine_grid(theta, (G, C, k, k)) [align_corners=False]."""
    base = (2.0 * np.arange(k) + 1.0) / k - 1.0            # pixel-center coords
    xs, ys = np.meshgrid(base, base)                        # xs varies along j (width)
    coords = np.stack([xs, ys, np.ones_like(xs)], axis=-1)  # (k, k, 3)
    grid = np.einsum('gab,ijb->gija', theta, coords)        # (G, k, k, 2) -> (gx, gy)
    return jnp.asarray(grid, dtype=jnp.float32)


def grid_sample_bilinear_zeros(inp, grid):
    """torch.nn.functional.grid_sample(inp, grid), mode='bilinear',
    padding_mode='zeros', align_corners=False.  inp:(G,C,H,W) grid:(G,Hg,Wg,2)."""
    _, _, H, W = inp.shape

    def sample_one(img, g):
        gx, gy = g[..., 0], g[..., 1]
        ix = ((gx + 1.0) * W - 1.0) * 0.5
        iy = ((gy + 1.0) * H - 1.0) * 0.5
        ix0, iy0 = jnp.floor(ix), jnp.floor(iy)
        ix1, iy1 = ix0 + 1.0, iy0 + 1.0
        wx1, wy1 = ix - ix0, iy - iy0
        wx0, wy0 = 1.0 - wx1, 1.0 - wy1

        def tap(yi, xi):
            valid = (xi >= 0) & (xi <= W - 1) & (yi >= 0) & (yi <= H - 1)
            yc = jnp.clip(yi, 0, H - 1).astype(jnp.int32)
            xc = jnp.clip(xi, 0, W - 1).astype(jnp.int32)
            return jnp.where(valid[None], img[:, yc, xc], 0.0)   # (C, Hg, Wg)

        return (tap(iy0, ix0) * (wy0 * wx0)[None] +
                tap(iy0, ix1) * (wy0 * wx1)[None] +
                tap(iy1, ix0) * (wy1 * wx0)[None] +
                tap(iy1, ix1) * (wy1 * wx1)[None])

    return jax.vmap(sample_one)(inp, grid)


def make_permutation(M, N):
    # TODO(synk): make_permutation source was not provided; assuming the standard
    # RTN interleave perm[n*M + m] = m*N + n so AvgPool3d((M,1,1)) averages the M
    # channel responses of each of the N features.  The Pallas kernel fuses this
    # regrouping + mean directly into its reduction over M.
    return [m * N + n for n in range(N) for m in range(M)]


def _round_up(v, mult):
    return (v + mult - 1) // mult * mult


# ------------------------------- Pallas kernel --------------------------------

def _rtn_kernel(cols_ref, w_ref, o_ref, *, M, N_pad, G):
    """cols_ref: (1, M, KK, P_pad)  image patches for one batch element
       w_ref   : (M, G*N_pad, KK)   rotated filters, 1/M pre-folded, N padded to 8
       o_ref   : (1, N_pad, P_pad)  fused conv + max(G) + mean(M) output
    """
    acc = None
    for m in range(M):                                       # static unroll, M small
        # ONE fused MXU matmul covering all G rotations and all N features.
        s = jnp.dot(w_ref[m], cols_ref[0, m],
                    preferred_element_type=jnp.float32)      # (G*N_pad, P_pad)
        # MaxPool3d((G,1,1)): max over the G rotation blocks (sublane-aligned slices).
        smax = s[0:N_pad]
        for g in range(1, G):
            smax = jnp.maximum(smax, s[g * N_pad:(g + 1) * N_pad])
        # channel permutation + AvgPool3d((M,1,1)) == sum over m (1/M folded into w).
        acc = smax if acc is None else acc + smax
    o_ref[0] = acc.astype(o_ref.dtype)                       # single lane-dense store


def rtn_core_forward(x, w, flow_field, M, N, G, k, compute_dtype=jnp.float32):
    """x: (B, M, H, W) f32; w: (M*N, 1, k, k) f32; flow_field: (G, k, k, 2).

    compute_dtype: matmul-input dtype.  f32 keeps parity with the PyTorch module;
    jnp.bfloat16 is the recommended choice on v6e/v7x at larger shapes
    (accumulation stays f32 via preferred_element_type).
    """
    B, Mx, H, W = x.shape
    assert Mx == M
    Ho, Wo = H - k + 1, W - k + 1
    P, KK = Ho * Wo, k * k
    P_pad = _round_up(P, 128)                 # lane-dense, unmasked output stores
    N_pad = _round_up(max(N, 8), 8)           # sublane-aligned rotation groups

    # --- rotate filters (tiny parameter setup, plain JAX) ---------------------
    w_rep2 = jnp.broadcast_to(w[:, 0][None], (G, M * N, k, k))      # expand over G
    w_rot = grid_sample_bilinear_zeros(w_rep2, flow_field)          # (G, M*N, k, k)
    wmat = w_rot.reshape(G, M, N, KK).transpose(1, 0, 2, 3)         # (M, G, N, k*k)
    wmat = wmat * (1.0 / M)                   # fold AvgPool mean (positive -> commutes with max)
    w_pad = jnp.zeros((M, G, N_pad, KK), jnp.float32).at[:, :, :N, :].set(wmat)
    w_flat = w_pad.reshape(M, G * N_pad, KK).astype(compute_dtype)  # (M, G*N_pad, k*k)

    # --- im2col (layout glue), lane-padded to a multiple of 128 ---------------
    # TODO(synk): at realistic H,W this k*k HBM inflation should be avoided by
    # DMA'ing the (1, M, H, W) x tile and building patch rows inside the kernel;
    # at these toy shapes the whole problem fits comfortably in VMEM.
    patches = [x[:, :, di:di + Ho, dj:dj + Wo]
               for di in range(k) for dj in range(k)]
    cols = jnp.stack(patches, axis=2).reshape(B, M, KK, P)          # (B, M, k*k, P)
    cols = jnp.pad(cols, ((0, 0), (0, 0), (0, 0), (0, P_pad - P)))
    cols = cols.astype(compute_dtype)

    kernel = functools.partial(_rtn_kernel, M=M, N_pad=N_pad, G=G)
    out = pl.pallas_call(
        kernel,
        out_shape=jax.ShapeDtypeStruct((B, N_pad, P_pad), jnp.float32),
        grid_spec=pltpu.PrefetchScalarGridSpec(
            num_scalar_prefetch=0,
            grid=(B,),                                       # M handled in-kernel
            in_specs=[
                # per-batch patch slab (M folded into the block, not the grid)
                pl.BlockSpec((1, M, KK, P_pad), lambda b: (b, 0, 0, 0)),
                # full weight matrix, constant block index -> DMA'd into VMEM once
                pl.BlockSpec((M, G * N_pad, KK), lambda b: (0, 0, 0)),
            ],
            out_specs=pl.BlockSpec((1, N_pad, P_pad), lambda b: (b, 0, 0)),
        ),
        compiler_params=pltpu.CompilerParams(
            dimension_semantics=("parallel",)),              # batch axis feeds both v7x TCs
    )(cols, w_flat)

    return out[:, :N, :P].reshape(B, N, Ho, Wo)


# ------------------------------ pure-JAX reference -----------------------------

def rtn_core_reference(x, w, flow_field, M, N, G, k):
    """Plain-JAX reference of the module's forward (same assumed permutation)."""
    B, _, H, W = x.shape
    Ho, Wo = H - k + 1, W - k + 1
    P, KK = Ho * Wo, k * k
    w_rep2 = jnp.broadcast_to(w[:, 0][None], (G, M * N, k, k))
    w_rot = grid_sample_bilinear_zeros(w_rep2, flow_field)
    wmat = w_rot.reshape(G, M, N, KK).transpose(1, 0, 2, 3)         # (M, G, N, k*k)
    patches = [x[:, :, di:di + Ho, dj:dj + Wo]
               for di in range(k) for dj in range(k)]
    cols = jnp.stack(patches, axis=2).reshape(B, M, KK, P)          # (B, M, k*k, P)
    s = jnp.einsum('mgnk,bmkp->bmgnp', wmat, cols)                  # grouped conv2d
    return s.max(axis=2).mean(axis=1).reshape(B, N, Ho, Wo)         # max(G)+perm+mean(M)


# ----------------------------------- main --------------------------------------

if __name__ == "__main__":
    M, N, G, alpha, k = 4, 3, 4, 45.0, 5
    B, H, W = 2, 16, 16

    key = jax.random.PRNGKey(0)
    kx, kw = jax.random.split(key)
    x = jax.random.normal(kx, (B, M, H, W), dtype=jnp.float32)
    w = jax.random.normal(kw, (M * N, 1, k, k), dtype=jnp.float32)   # torch.randn init

    theta = make_rotations(-alpha, alpha, G)                          # (G, 2, 3)
    flow_field = affine_grid(theta, k)                                # (G, k, k, 2)

    out = rtn_core_forward(x, w, flow_field, M, N, G, k)
    out = jax.block_until_ready(out)

    ref = rtn_core_reference(x, w, flow_field, M, N, G, k)
    assert out.shape == ref.shape == (B, N, H - k + 1, W - k + 1)
    assert jnp.allclose(out, ref, atol=1e-4, rtol=1e-4), \
        float(jnp.abs(out - ref).max())

    print("KERNEL_OK")
</pallas_src>

<mosaic_0001>
module attributes {stable_mosaic.version = 11 : i64} {
  func.func @_rtn_kernel(%arg0: i32, %arg1: memref<1x4x25x256xf32, #tpu.memory_space<vmem>>, %arg2: memref<4x32x25xf32, #tpu.memory_space<vmem>>, %arg3: memref<1x8x256xf32, #tpu.memory_space<vmem>>) attributes {dimension_semantics = [#tpu.dimension_semantics<parallel>], iteration_bounds = array<i64: 2>, scalar_prefetch = 0 : i64, scratch_operands = 0 : i64, tpu.core_type = #tpu.core_type<tc>, window_params = [{transform_indices = @transform_0, window_bounds = array<i64: 1, 4, 25, 256>}, {pipeline_mode = #tpu.pipeline_mode<synchronous>, transform_indices = @transform_1, window_bounds = array<i64: 4, 32, 25>}, {transform_indices = @transform_2, window_bounds = array<i64: 1, 8, 256>}]} {
    %c0 = arith.constant 0 : index
    %c0_0 = arith.constant 0 : index
    %c0_1 = arith.constant 0 : index
    %0 = vector.load %arg2[%c0, %c0_0, %c0_1] : memref<4x32x25xf32, #tpu.memory_space<vmem>>, vector<1x32x25xf32>
    %1 = vector.shape_cast %0 : vector<1x32x25xf32> to vector<32x25xf32>
    %c0_2 = arith.constant 0 : index
    %c0_3 = arith.constant 0 : index
    %c0_4 = arith.constant 0 : index
    %c0_5 = arith.constant 0 : index
    %2 = vector.load %arg1[%c0_2, %c0_3, %c0_4, %c0_5] : memref<1x4x25x256xf32, #tpu.memory_space<vmem>>, vector<1x1x25x256xf32>
    %3 = vector.shape_cast %2 : vector<1x1x25x256xf32> to vector<25x256xf32>
    %cst = arith.constant dense<0.000000e+00> : vector<32x256xf32>
    %4 = tpu.matmul %1, %3, %cst {dimension_numbers = #tpu.dot_dimension_numbers<[1], [0], [0], [1], [0, 0, 1, 1], [], []>} : vector<32x25xf32>, vector<25x256xf32>, vector<32x256xf32> -> vector<32x256xf32>
    %5 = vector.extract_strided_slice %4 {offsets = [0, 0], sizes = [8, 256], strides = [1, 1]} : vector<32x256xf32> to vector<8x256xf32>
    %6 = vector.extract_strided_slice %4 {offsets = [8, 0], sizes = [8, 256], strides = [1, 1]} : vector<32x256xf32> to vector<8x256xf32>
    %7 = arith.maximumf %5, %6 : vector<8x256xf32>
    %8 = vector.extract_strided_slice %4 {offsets = [16, 0], sizes = [8, 256], strides = [1, 1]} : vector<32x256xf32> to vector<8x256xf32>
    %9 = arith.maximumf %7, %8 : vector<8x256xf32>
    %10 = vector.extract_strided_slice %4 {offsets = [24, 0], sizes = [8, 256], strides = [1, 1]} : vector<32x256xf32> to vector<8x256xf32>
    %11 = arith.maximumf %9, %10 : vector<8x256xf32>
    %c1 = arith.constant 1 : index
    %c0_6 = arith.constant 0 : index
    %c0_7 = arith.constant 0 : index
    %12 = vector.load %arg2[%c1, %c0_6, %c0_7] : memref<4x32x25xf32, #tpu.memory_space<vmem>>, vector<1x32x25xf32>
    %13 = vector.shape_cast %12 : vector<1x32x25xf32> to vector<32x25xf32>
    %c0_8 = arith.constant 0 : index
    %c1_9 = arith.constant 1 : index
    %c0_10 = arith.constant 0 : index
    %c0_11 = arith.constant 0 : index
    %14 = vector.load %arg1[%c0_8, %c1_9, %c0_10, %c0_11] : memref<1x4x25x256xf32, #tpu.memory_space<vmem>>, vector<1x1x25x256xf32>
    %15 = vector.shape_cast %14 : vector<1x1x25x256xf32> to vector<25x256xf32>
    %cst_12 = arith.constant dense<0.000000e+00> : vector<32x256xf32>
    %16 = tpu.matmul %13, %15, %cst_12 {dimension_numbers = #tpu.dot_dimension_numbers<[1], [0], [0], [1], [0, 0, 1, 1], [], []>} : vector<32x25xf32>, vector<25x256xf32>, vector<32x256xf32> -> vector<32x256xf32>
    %17 = vector.extract_strided_slice %16 {offsets = [0, 0], sizes = [8, 256], strides = [1, 1]} : vector<32x256xf32> to vector<8x256xf32>
    %18 = vector.extract_strided_slice %16 {offsets = [8, 0], sizes = [8, 256], strides = [1, 1]} : vector<32x256xf32> to vector<8x256xf32>
    %19 = arith.maximumf %17, %18 : vector<8x256xf32>
    %20 = vector.extract_strided_slice %16 {offsets = [16, 0], sizes = [8, 256], strides = [1, 1]} : vector<32x256xf32> to vector<8x256xf32>
    %21 = arith.maximumf %19, %20 : vector<8x256xf32>
    %22 = vector.extract_strided_slice %16 {offsets = [24, 0], sizes = [8, 256], strides = [1, 1]} : vector<32x256xf32> to vector<8x256xf32>
    %23 = arith.maximumf %21, %22 : vector<8x256xf32>
    %24 = arith.addf %11, %23 : vector<8x256xf32>
    %c2 = arith.constant 2 : index
    %c0_13 = arith.constant 0 : index
    %c0_14 = arith.constant 0 : index
    %25 = vector.load %arg2[%c2, %c0_13, %c0_14] : memref<4x32x25xf32, #tpu.memory_space<vmem>>, vector<1x32x25xf32>
    %26 = vector.shape_cast %25 : vector<1x32x25xf32> to vector<32x25xf32>
    %c0_15 = arith.constant 0 : index
    %c2_16 = arith.constant 2 : index
    %c0_17 = arith.constant 0 : index
    %c0_18 = arith.constant 0 : index
    %27 = vector.load %arg1[%c0_15, %c2_16, %c0_17, %c0_18] : memref<1x4x25x256xf32, #tpu.memory_space<vmem>>, vector<1x1x25x256xf32>
    %28 = vector.shape_cast %27 : vector<1x1x25x256xf32> to vector<25x256xf32>
    %cst_19 = arith.constant dense<0.000000e+00> : vector<32x256xf32>
    %29 = tpu.matmul %26, %28, %cst_19 {dimension_numbers = #tpu.dot_dimension_numbers<[1], [0], [0], [1], [0, 0, 1, 1], [], []>} : vector<32x25xf32>, vector<25x256xf32>, vector<32x256xf32> -> vector<32x256xf32>
    %30 = vector.extract_strided_slice %29 {offsets = [0, 0], sizes = [8, 256], strides = [1, 1]} : vector<32x256xf32> to vector<8x256xf32>
    %31 = vector.extract_strided_slice %29 {offsets = [8, 0], sizes = [8, 256], strides = [1, 1]} : vector<32x256xf32> to vector<8x256xf32>
    %32 = arith.maximumf %30, %31 : vector<8x256xf32>
    %33 = vector.extract_strided_slice %29 {offsets = [16, 0], sizes = [8, 256], strides = [1, 1]} : vector<32x256xf32> to vector<8x256xf32>
    %34 = arith.maximumf %32, %33 : vector<8x256xf32>
    %35 = vector.extract_strided_slice %29 {offsets = [24, 0], sizes = [8, 256], strides = [1, 1]} : vector<32x256xf32> to vector<8x256xf32>
    %36 = arith.maximumf %34, %35 : vector<8x256xf32>
    %37 = arith.addf %24, %36 : vector<8x256xf32>
    %c3 = arith.constant 3 : index
    %c0_20 = arith.constant 0 : index
    %c0_21 = arith.constant 0 : index
    %38 = vector.load %arg2[%c3, %c0_20, %c0_21] : memref<4x32x25xf32, #tpu.memory_space<vmem>>, vector<1x32x25xf32>
    %39 = vector.shape_cast %38 : vector<1x32x25xf32> to vector<32x25xf32>
    %c0_22 = arith.constant 0 : index
    %c3_23 = arith.constant 3 : index
    %c0_24 = arith.constant 0 : index
    %c0_25 = arith.constant 0 : index
    %40 = vector.load %arg1[%c0_22, %c3_23, %c0_24, %c0_25] : memref<1x4x25x256xf32, #tpu.memory_space<vmem>>, vector<1x1x25x256xf32>
    %41 = vector.shape_cast %40 : vector<1x1x25x256xf32> to vector<25x256xf32>
    %cst_26 = arith.constant dense<0.000000e+00> : vector<32x256xf32>
    %42 = tpu.matmul %39, %41, %cst_26 {dimension_numbers = #tpu.dot_dimension_numbers<[1], [0], [0], [1], [0, 0, 1, 1], [], []>} : vector<32x25xf32>, vector<25x256xf32>, vector<32x256xf32> -> vector<32x256xf32>
    %43 = vector.extract_strided_slice %42 {offsets = [0, 0], sizes = [8, 256], strides = [1, 1]} : vector<32x256xf32> to vector<8x256xf32>
    %44 = vector.extract_strided_slice %42 {offsets = [8, 0], sizes = [8, 256], strides = [1, 1]} : vector<32x256xf32> to vector<8x256xf32>
    %45 = arith.maximumf %43, %44 : vector<8x256xf32>
    %46 = vector.extract_strided_slice %42 {offsets = [16, 0], sizes = [8, 256], strides = [1, 1]} : vector<32x256xf32> to vector<8x256xf32>
    %47 = arith.maximumf %45, %46 : vector<8x256xf32>
    %48 = vector.extract_strided_slice %42 {offsets = [24, 0], sizes = [8, 256], strides = [1, 1]} : vector<32x256xf32> to vector<8x256xf32>
    %49 = arith.maximumf %47, %48 : vector<8x256xf32>
    %50 = arith.addf %37, %49 : vector<8x256xf32>
    %c0_27 = arith.constant 0 : index
    %c0_28 = arith.constant 0 : index
    %c0_29 = arith.constant 0 : index
    %51 = vector.load %arg3[%c0_27, %c0_28, %c0_29] : memref<1x8x256xf32, #tpu.memory_space<vmem>>, vector<1x8x256xf32>
    %52 = vector.shape_cast %51 : vector<1x8x256xf32> to vector<8x256xf32>
    %53 = vector.shape_cast %50 : vector<8x256xf32> to vector<1x8x256xf32>
    tpu.vector_store %arg3[%c0_27, %c0_28, %c0_29], %53 {strides = array<i32>} : memref<1x8x256xf32, #tpu.memory_space<vmem>>, vector<1x8x256xf32>,
    return
  }
  func.func @transform_0(%arg0: i32) -> (i32, i32, i32, i32) {
    %c0_i32 = arith.constant 0 : i32
    %c0_i32_0 = arith.constant 0 : i32
    %c0_i32_1 = arith.constant 0 : i32
    %c0_i32_2 = arith.constant 0 : i32
    return %arg0, %c0_i32, %c0_i32_0, %c0_i32_1 : i32, i32, i32, i32
  }
  func.func @transform_1(%arg0: i32) -> (i32, i32, i32) {
    %c0_i32 = arith.constant 0 : i32
    %c0_i32_0 = arith.constant 0 : i32
    %c0_i32_1 = arith.constant 0 : i32
    %c0_i32_2 = arith.constant 0 : i32
    return %c0_i32, %c0_i32_0, %c0_i32_1 : i32, i32, i32
  }
  func.func @transform_2(%arg0: i32) -> (i32, i32, i32) {
    %c0_i32 = arith.constant 0 : i32
    %c0_i32_0 = arith.constant 0 : i32
    %c0_i32_1 = arith.constant 0 : i32
    return %arg0, %c0_i32, %c0_i32_0 : i32, i32, i32
  }
}

</mosaic_0001>

<bundles_post_ra>
// kernel: tpu_custom_call.1
= control target key start
LH: loop header
LB: loop body
LE: loop exit
PB: predicated region body
PF: predicated region fallthrough
CT: control target
= control target key end

     0   :  { %7 = vsyncpa [#allocation3], 0  ;;  %s1029_s0 = inlined_call_operand.vmem [shape: f32[2,4,25,256], index: 0, kind: input, shape index: {}]   ;;  %s1030_s1 = inlined_call_operand.vmem [shape: f32[4,32,25], index: 1, kind: input, shape index: {}]   ;;  %s1031_s2 = inlined_call_operand.hbm [shape: f32[2,8,256], index: 2, kind: output, shape index: {}]  }
   0x1   :  { %9 = vsyncpa [#allocation3 + $0x1], 0  ;;  %s818_s9 = smov 0   ;;  %s820_s10 = smov 0  }
   0x2   :  { %s822_s11 = smov 0   ;;  %s824_s12 = smov 0  }
   0x3 LB: > { %s839_s13 = sadd.s32 4294967295, %s801_s12   ;;  %s610_s14 = sadd.s32 4294967294, %s801_s12   ;;  %s801_s12 = sphi %s824_s12, %s1037_s12   ;;  %s797_s11 = sphi %s822_s11, %s1036_s11   ;;  %s793_s10 = sphi %s820_s10, %s1035_s10   ;;  %s789_s9 = sphi %s818_s9, %s1034_s9  }
   0x4   : > { %s843_s15 = sadd.s32 1, %s801_s12   ;;  %s69_s16 = sadd.s32 1, %s797_s11 }
   0x5   : > { %s66_s17 = ssub.s32 %s801_s12, %s843_s15  ;;  %p79_p0 = scmp.ne.s32.totalorder %s797_s11, %s793_s10 }
   0x6   : > { %p67_p1 = scmp.eq.s32.totalorder %s66_s17, 0  ;;  %p80_p2 = scmp.eq.s32.totalorder %s839_s13, 1 }
   0x7   : > { %p85_p3 = scmp.ne.s32.totalorder %s793_s10, %s789_s9  ;;  %p86_p4 = scmp.eq.s32.totalorder %s610_s14, 1 }
   0x8   : > { %s854_s18 = scalar_select %p67_p1, %s797_s11, %s69_s16  }
   0x9   : > { %p856_p5 = por %p80_p2, %p79_p0  ;;  %p860_p6 = por %p86_p4, %p85_p3 }
   0xa   : > { %p613_p7 = scmp.ge.s32.totalorder %s801_s12, 1  ;;  %p115_p8 = scmp.lt.s32.totalorder %s801_s12, 3 }
   0xc   : > { %p116_p9 = pnand %p613_p7, %p115_p8 }
   0xd   : > { %p137_p10 = scmp.lt.s32.totalorder (!%p116_p9), %s839_s13, 1  ;;  %s134_s17 = sand.u32 (!%p116_p9), 1, %s793_s10  }
   0xe   : > { %119 = sbr.rel (%p116_p9) target bundleno = 229 (0xe5), region = 28  ;;  %s535_s28 = scalar_lea.sflag (!%p116_p9), [#allocation3], %s134_s17 }
   0xf   : > { %s759_s5 = scalar_lea.hbm (!%p116_p9), %s1031_s2, 32 }
  0x13   : > { %s138_s21 = scalar_select %p137_p10, %s839_s13, 1  ;;  %vm167_vm0 = vcmask 1040384   ;;  %v142_v16 = vld [vmem:[%s1030_s1] sm:$0xff]  ;;  %vm154_vm1 = vcmask 203776   ;;  %v143_v30 = vld [vmem:[%s1030_s1 + $0x8] sm:$0xff]  ;;  %v144_v36 = vld [vmem:[%s1030_s1 + $0x10] sm:$0xff] }
  0x14   : > { %v627_v17 = vld [vmem:[%s1030_s1 + $0x20] sm:$0xff]  ;;  %v628_v31 = vld [vmem:[%s1030_s1 + $0x28] sm:$0xff]  ;;  %v629_v37 = vld [vmem:[%s1030_s1 + $0x30] sm:$0xff] }
  0x15   : > { %s698_s22 = sshll.u32 %s138_s21, 8  ;;  %v145_v38 = vld [vmem:[%s1030_s1 + $0x18] sm:$0xff]  ;;  %v649_v40 = vld [vmem:[%s1030_s1 + $0x40] sm:$0xff]  ;;  %v650_v42 = vld [vmem:[%s1030_s1 + $0x48] sm:$0xff]  ;;  %s614_s21 = sshll.u32 %s134_s17, 4 }
  0x16   : > { %s871_s25 = scalar_lea.vmem %s1029_s0, %s698_s22  ;;  %v630_v39 = vld [vmem:[%s1030_s1 + $0x38] sm:$0xff]  ;;  %v671_v41 = vld [vmem:[%s1030_s1 + $0x60] sm:$0xff]  ;;  %v672_v43 = vld [vmem:[%s1030_s1 + $0x68] sm:$0xff]  ;;  %s699_s22 = sshll.u32 %s839_s13, 4 }
  0x17   : > { %v152_v0 = vld [vmem:[%s871_s25 + $0x30] sm:$0x1]  ;;  %v153_v1 = vld [vmem:[%s871_s25 + $0x38] sm:$0x1]  ;;  %v150_v4 = vld [vmem:[%s871_s25 + $0x20] sm:$0xff]  ;;  %s136_s13 = scalar_lea.vmem [#allocation2], %s614_s21 }
  0x18   : > { %v637_v2 = vld [vmem:[%s871_s25 + $0x70] sm:$0x1]  ;;  %617 = vmatpush.msk.msra.mxu0 %vm167_vm0, %v152_v0  ;;  %622 = vmatpush.msk.msra.mxu1 %vm167_vm0, %v153_v1  ;;  %v638_v3 = vld [vmem:[%s871_s25 + $0x78] sm:$0x1]  ;;  %v151_v5 = vld [vmem:[%s871_s25 + $0x28] sm:$0xff]  ;;  %s548_s26 = sshll.u32 %s136_s13, 4  ;;  %s549_s26 = int_to_ptr.vmem [resolvable:$true] %s548_s26 }
  0x19   : > { %639 = vmatpush.msk.msra.mxu2 %vm167_vm0, %v637_v2  ;;  %644 = vmatpush.msk.msra.mxu3 %vm167_vm0, %v638_v3  ;;  %v635_v6 = vld [vmem:[%s871_s25 + $0x60] sm:$0xff]  ;;  %v636_v7 = vld [vmem:[%s871_s25 + $0x68] sm:$0xff]  ;;  %v148_v8 = vld [vmem:[%s871_s25 + $0x10] sm:$0xff] }
  0x1a   : > { %187 = vmatpush.msra.mxu0 %v150_v4  ;;  %216 = vmatpush.msra.mxu1 %v151_v5  ;;  %v149_v9 = vld [vmem:[%s871_s25 + $0x18] sm:$0xff]  ;;  %v633_v10 = vld [vmem:[%s871_s25 + $0x50] sm:$0xff]  ;;  %v146_v12 = vld [vmem:[%s871_s25] sm:$0xff] }
  0x1b   : > { %v634_v11 = vld [vmem:[%s871_s25 + $0x58] sm:$0xff]  ;;  %283 = vmatpush.msra.mxu2 %v635_v6  ;;  %312 = vmatpush.msra.mxu3 %v636_v7  ;;  %v147_v13 = vld [vmem:[%s871_s25 + $0x8] sm:$0xff]  ;;  %v631_v14 = vld [vmem:[%s871_s25 + $0x40] sm:$0xff] }
  0x1c   : > { %188 = vmatpush.msra.mxu0 %v148_v8  ;;  %217 = vmatpush.msra.mxu1 %v149_v9  ;;  %v632_v15 = vld [vmem:[%s871_s25 + $0x48] sm:$0xff]  ;;  %v681_v18 = vld [vmem:[%s871_s25 + $0xf0] sm:$0x1]  ;;  %v682_v19 = vld [vmem:[%s871_s25 + $0xf8] sm:$0x1] }
  0x1d   : > { %284 = vmatpush.msra.mxu2 %v633_v10  ;;  %313 = vmatpush.msra.mxu3 %v634_v11  ;;  %v659_v20 = vld [vmem:[%s871_s25 + $0xb0] sm:$0x1]  ;;  %v660_v21 = vld [vmem:[%s871_s25 + $0xb8] sm:$0x1]  ;;  %v679_v22 = vld [vmem:[%s871_s25 + $0xe0] sm:$0xff] }
  0x1e   : > { %189 = vmatpush.msra.mxu0 %v146_v12  ;;  %218 = vmatpush.msra.mxu1 %v147_v13  ;;  %v680_v23 = vld [vmem:[%s871_s25 + $0xe8] sm:$0xff]  ;;  %v657_v24 = vld [vmem:[%s871_s25 + $0xa0] sm:$0xff]  ;;  %v677_v26 = vld [vmem:[%s871_s25 + $0xd0] sm:$0xff] }
  0x1f   : > { %285 = vmatpush.msra.mxu2 %v631_v14  ;;  %314 = vmatpush.msra.mxu3 %v632_v15  ;;  %v658_v25 = vld [vmem:[%s871_s25 + $0xa8] sm:$0xff]  ;;  %v678_v27 = vld [vmem:[%s871_s25 + $0xd8] sm:$0xff]  ;;  %v655_v28 = vld [vmem:[%s871_s25 + $0x90] sm:$0xff] }
  0x20   : > { %618 = vmatmul.msk.f32.vlgmr.msra.gmra.mxu0 %vm154_vm1, %v142_v16  ;;  %623 = vmatmul.msk.f32.vlgmr.msra.gmra.mxu1 %vm154_vm1, %v142_v16  ;;  %v656_v29 = vld [vmem:[%s871_s25 + $0x98] sm:$0xff]  ;;  %v675_v32 = vld [vmem:[%s871_s25 + $0xc0] sm:$0xff]  ;;  %v676_v33 = vld [vmem:[%s871_s25 + $0xc8] sm:$0xff] }
  0x21   : > { %640 = vmatmul.msk.f32.vlgmr.msra.gmra.mxu2 %vm154_vm1, %v627_v17  ;;  %645 = vmatmul.msk.f32.vlgmr.msra.gmra.mxu3 %vm154_vm1, %v627_v17  ;;  %v653_v34 = vld [vmem:[%s871_s25 + $0x80] sm:$0xff]  ;;  %v654_v35 = vld [vmem:[%s871_s25 + $0x88] sm:$0xff]  ;;  %v651_v44 = vld [vmem:[%s1030_s1 + $0x50] sm:$0xff]  ;;  %s546_s25 = scalar_lea.hbm %s1031_s2, %s699_s22 }
  0x22   : > { %683 = vmatpush.msk.msrb.mxu2 %vm167_vm0, %v681_v18  ;;  %688 = vmatpush.msk.msrb.mxu3 %vm167_vm0, %v682_v19  ;;  %v673_v45 = vld [vmem:[%s1030_s1 + $0x70] sm:$0xff]  ;;  %v652_v46 = vld [vmem:[%s1030_s1 + $0x58] sm:$0xff]  ;;  %s550_s27 = sshll.u32 %s546_s25, 4  ;;  %s551_s27 = int_to_ptr.hbm [resolvable:$true] %s550_s27 }
  0x23   : > { %661 = vmatpush.msk.msrb.mxu0 %vm167_vm0, %v659_v20  ;;  %666 = vmatpush.msk.msrb.mxu1 %vm167_vm0, %v660_v21  ;;  %v674_v47 = vld [vmem:[%s1030_s1 + $0x78] sm:$0xff]  ;;  %s753_s29 = sshra.s32 %s551_s27, 4  ;;  %s754_s29 = int_to_ptr.hbm [resolvable:$true] %s753_s29 }
  0x24   : > { %479 = vmatpush.msrb.mxu2 %v679_v22  ;;  %508 = vmatpush.msrb.mxu3 %v680_v23  ;;  %s755_s30 = scalar_lea.hbm %s754_s29, 16  ;;  %p760_p0 = scmp.lt.s32.totalorder %s754_s29, %s1031_s2 }
  0x25   : > { %381 = vmatpush.msrb.mxu0 %v657_v24  ;;  %410 = vmatpush.msrb.mxu1 %v658_v25  ;;  %p756_p11 = scmp.ne.s32.totalorder %s754_s29, %s755_s30  ;;  %p761_p1 = scmp.lt.s32.totalorder %s759_s5, %s755_s30 }
  0x26   : > { %480 = vmatpush.msrb.mxu2 %v677_v26  ;;  %509 = vmatpush.msrb.mxu3 %v678_v27 }
  0x27   : > { %382 = vmatpush.msrb.mxu0 %v655_v28  ;;  %411 = vmatpush.msrb.mxu1 %v656_v29  ;;  %p757_p12 = pnand %p756_p11, %p856_p5  ;;  %p762_p2 = por %p761_p1, %p760_p0 }
  0x28   : > { %619 = vmatmul.msk.f32.gmra.mxu0 %vm154_vm1, %v143_v30  ;;  %624 = vmatmul.msk.f32.gmra.mxu1 %vm154_vm1, %v143_v30 }
  0x29   : > { %641 = vmatmul.msk.f32.gmra.mxu2 %vm154_vm1, %v628_v31  ;;  %646 = vmatmul.msk.f32.gmra.mxu3 %vm154_vm1, %v628_v31  ;;  %p758_p13 = pneg %p757_p12 }
  0x2a   : > { %481 = vmatpush.msrb.mxu2 %v675_v32  ;;  %510 = vmatpush.msrb.mxu3 %v676_v33 }
  0x2b   : > { %383 = vmatpush.msrb.mxu0 %v653_v34  ;;  %412 = vmatpush.msrb.mxu1 %v654_v35  ;;  %p763_p3 = pnand %p762_p2, %p758_p13 }
  0x30   : > { %620 = vmatmul.msk.f32.gmra.mxu0 %vm154_vm1, %v144_v36  ;;  %625 = vmatmul.msk.f32.gmra.mxu1 %vm154_vm1, %v144_v36 }
  0x31   : > { %642 = vmatmul.msk.f32.gmra.mxu2 %vm154_vm1, %v629_v37  ;;  %647 = vmatmul.msk.f32.gmra.mxu3 %vm154_vm1, %v629_v37 }
  0x38   : > { %621 = vmatmul.msk.f32.gmra.mxu0 %vm154_vm1, %v145_v38  ;;  %626 = vmatmul.msk.f32.gmra.mxu1 %vm154_vm1, %v145_v38 }
  0x39   : > { %643 = vmatmul.msk.f32.gmra.mxu2 %vm154_vm1, %v630_v39  ;;  %648 = vmatmul.msk.f32.gmra.mxu3 %vm154_vm1, %v630_v39 }
  0x40   : > { %662 = vmatmul.msk.f32.vlgmr.msrb.gmra.mxu0 %vm154_vm1, %v649_v40  ;;  %667 = vmatmul.msk.f32.vlgmr.msrb.gmra.mxu1 %vm154_vm1, %v649_v40 }
  0x41   : > { %684 = vmatmul.msk.f32.vlgmr.msrb.gmra.mxu2 %vm154_vm1, %v671_v41  ;;  %689 = vmatmul.msk.f32.vlgmr.msrb.gmra.mxu3 %vm154_vm1, %v671_v41 }
  0x48   : > { %663 = vmatmul.msk.f32.gmra.mxu0 %vm154_vm1, %v650_v42  ;;  %668 = vmatmul.msk.f32.gmra.mxu1 %vm154_vm1, %v650_v42 }
  0x49   : > { %685 = vmatmul.msk.f32.gmra.mxu2 %vm154_vm1, %v672_v43  ;;  %690 = vmatmul.msk.f32.gmra.mxu3 %vm154_vm1, %v672_v43 }
  0x50   : > { %664 = vmatmul.msk.f32.gmra.mxu0 %vm154_vm1, %v651_v44  ;;  %669 = vmatmul.msk.f32.gmra.mxu1 %vm154_vm1, %v651_v44 }
  0x51   : > { %686 = vmatmul.msk.f32.gmra.mxu2 %vm154_vm1, %v673_v45  ;;  %691 = vmatmul.msk.f32.gmra.mxu3 %vm154_vm1, %v673_v45 }
  0x58   : > { %665 = vmatmul.msk.f32.gmra.mxu0 %vm154_vm1, %v652_v46  ;;  %670 = vmatmul.msk.f32.gmra.mxu1 %vm154_vm1, %v652_v46 }
  0x59   : > { %687 = vmatmul.msk.f32.gmra.mxu2 %vm154_vm1, %v674_v47  ;;  %692 = vmatmul.msk.f32.gmra.mxu3 %vm154_vm1, %v674_v47 }
  0x9d   : > { %v191_v48 = vpop.f32.mrf.mxu0  ;;  %v220_v49 = vpop.f32.mrf.mxu1 }
  0xa4   : > { %v287_v50 = vpop.f32.mrf.mxu2  ;;  %v316_v51 = vpop.f32.mrf.mxu3 }
  0xa5   : > { %v194_v52 = vpop.f32.mrf.mxu0  ;;  %v223_v53 = vpop.f32.mrf.mxu1 }
  0xa6   : > { %v232_v12 = vmax.f32 %v191_v48, %v194_v52  ;;  %v233_v13 = vmax.f32 %v220_v49, %v223_v53 }
  0xac   : > { %v290_v54 = vpop.f32.mrf.mxu2  ;;  %v319_v55 = vpop.f32.mrf.mxu3 }
  0xad   : > { %v197_v56 = vpop.f32.mrf.mxu0  ;;  %v226_v57 = vpop.f32.mrf.mxu1  ;;  %v328_v10 = vmax.f32 %v287_v50, %v290_v54  ;;  %v329_v11 = vmax.f32 %v316_v51, %v319_v55 }
  0xae   : > { %v234_v20 = vmax.f32 %v232_v12, %v197_v56  ;;  %v235_v21 = vmax.f32 %v233_v13, %v226_v57 }
  0xb4   : > { %v293_v58 = vpop.f32.mrf.mxu2  ;;  %v322_v59 = vpop.f32.mrf.mxu3 }
  0xb5   : > { %v200_v60 = vpop.f32.mrf.mxu0  ;;  %v229_v61 = vpop.f32.mrf.mxu1  ;;  %v330_v16 = vmax.f32 %v328_v10, %v293_v58  ;;  %v331_v17 = vmax.f32 %v329_v11, %v322_v59 }
  0xb6   : > { %v236_v28 = vmax.f32 %v234_v20, %v200_v60  ;;  %v237_v29 = vmax.f32 %v235_v21, %v229_v61 }
  0xbc   : > { %v296_v62 = vpop.f32.mrf.mxu2  ;;  %v325_v63 = vpop.f32.mrf.mxu3 }
  0xbd   : > { %v385_v0 = vpop.f32.mrf.mxu0  ;;  %v414_v1 = vpop.f32.mrf.mxu1  ;;  %v332_v24 = vmax.f32 %v330_v16, %v296_v62  ;;  %v333_v25 = vmax.f32 %v331_v17, %v325_v63 }
  0xbf   : > { %v334_v34 = vadd.f32 %v332_v24, %v236_v28  ;;  %v335_v35 = vadd.f32 %v333_v25, %v237_v29 }
  0xc4   : > { %v483_v2 = vpop.f32.mrf.mxu2  ;;  %v512_v3 = vpop.f32.mrf.mxu3 }
  0xc5   : > { %v388_v4 = vpop.f32.mrf.mxu0  ;;  %v417_v5 = vpop.f32.mrf.mxu1 }
  0xc6   : > { %v426_v18 = vmax.f32 %v385_v0, %v388_v4  ;;  %v427_v19 = vmax.f32 %v414_v1, %v417_v5 }
  0xcc   : > { %v486_v6 = vpop.f32.mrf.mxu2  ;;  %v515_v7 = vpop.f32.mrf.mxu3 }
  0xcd   : > { %v391_v8 = vpop.f32.mrf.mxu0  ;;  %v420_v9 = vpop.f32.mrf.mxu1  ;;  %v524_v30 = vmax.f32 %v483_v2, %v486_v6  ;;  %v525_v31 = vmax.f32 %v512_v3, %v515_v7 }
  0xce   : > { %v428_v26 = vmax.f32 %v426_v18, %v391_v8  ;;  %v429_v27 = vmax.f32 %v427_v19, %v420_v9 }
  0xd4   : > { %v489_v14 = vpop.f32.mrf.mxu2  ;;  %v518_v15 = vpop.f32.mrf.mxu3 }
  0xd5   : > { %v394_v22 = vpop.f32.mrf.mxu0  ;;  %v423_v23 = vpop.f32.mrf.mxu1  ;;  %v526_v36 = vmax.f32 %v524_v30, %v489_v14  ;;  %v527_v37 = vmax.f32 %v525_v31, %v518_v15 }
  0xd6   : > { %v430_v32 = vmax.f32 %v428_v26, %v394_v22  ;;  %v431_v33 = vmax.f32 %v429_v27, %v423_v23 }
  0xd8   : > { %v432_v40 = vadd.f32 %v430_v32, %v334_v34  ;;  %v433_v41 = vadd.f32 %v431_v33, %v335_v35 }
  0xdc   : > { %v492_v38 = vpop.f32.mrf.mxu2  ;;  %v521_v39 = vpop.f32.mrf.mxu3 }
  0xdd   : > { %v528_v42 = vmax.f32 %v526_v36, %v492_v38  ;;  %v529_v43 = vmax.f32 %v527_v37, %v521_v39 }
  0xdf   : > { %v530_v44 = vadd.f32 %v528_v42, %v432_v40  ;;  %v531_v45 = vadd.f32 %v529_v43, %v433_v41 }
  0xe1   : > { %532 = vst [vmem:[%s136_s13] sm:$0xff] %v530_v44 }
  0xe2   : > { %533 = vst [vmem:[%s136_s13 + $0x8] sm:$0xff] %v531_v45 }
  0xe3   : > { %766 = shalt.err (!%p763_p3)
}
  0xe4   : > { %700 = dma.vmem_to_hbm [thread:$0]  (%p856_p5), %s549_s26, 256, %s551_s27, %s535_s28  }
  0xe5 PF: > { %p706_p4 = scmp.ge.s32.totalorder %s801_s12, 2  ;;  %s562_s8 = sand.u32 1, %s789_s9  }
  0xe6   : > { %s563_s14 = scalar_lea.sflag [#allocation3], %s562_s8 }
  0xe7   : > { %p703_p7 = pnand %p706_p4, %p860_p6 }
  0xe9   : > { %p704_p8 = pneg %p703_p7 }
  0xeb   : > { %784 = dma.done.wait (%p704_p8), %s563_s14, 256  }
  0xec   : > { %786 = vsyncadd (%p704_p8), %s563_s14, 4294967040  ;;  %p12_p9 = scmp.ge.s32.totalorder %s843_s15, 4   ;;  %s1034_s9 = smov %s793_s10 }
  0xed   : > { %s1035_s10 = smov %s797_s11  ;;  %s1036_s11 = smov %s854_s18 }
  0xee   : > { %s1037_s12 = smov %s843_s15  ;;  %14 = sbr.rel (!%p12_p9) target bundleno = 3 (0x3), region = 69 }
  0xf3   :  { %569 = vsyncpa [#allocation3], 1 }
  0xf4   :  { %571 = vsyncpa [#allocation3 + $0x1], 1 }

</bundles_post_ra>
